<compile_context>
chip_gen: v7x
topology: tpu7x:2x2x1
jax: 0.10.0
libtpu: 0.0.40
codegen_flags: <defaults>
</compile_context>

<pallas_src>
import functools

import jax
import jax.numpy as jnp
from jax import lax
from jax.experimental import pallas as pl
from jax.experimental.pallas import tpu as pltpu

BN_EPS = 1e-5
# Scoped-VMEM budget: comfortably under v7x's 64 MiB physical, generous on
# v5e/v6e (128 MiB physical).
_VMEM_LIMIT = 48 * 1024 * 1024
# Leading "parallel" grid axis for the stats pass (megacore sharding on v7x;
# harmless serial split on 1-TC chips).
_STATS_SHARDS = 2


def _round_up(x, m):
    return (x + m - 1) // m * m


# -----------------------------------------------------------------------------
# Pass 1: conv-as-GEMM -> bf16 y spill + per-channel (8, Cp) partial sums.
# The sum/sq accumulators stay VMEM-resident across the inner "arbitrary" axis;
# each outer-shard c owns its own (8, Cp) rows of the partial-sum outputs.
# -----------------------------------------------------------------------------
def conv_stats_kernel(a_ref, w_ref, y_ref, sum_ref, sq_ref):
    @pl.when(pl.program_id(1) == 0)
    def _():
        sum_ref[...] = jnp.zeros_like(sum_ref)
        sq_ref[...] = jnp.zeros_like(sq_ref)

    y = jnp.dot(a_ref[...], w_ref[...], preferred_element_type=jnp.float32)
    y_ref[...] = y.astype(y_ref.dtype)  # bf16 pre-BN activation spill

    # (tile_m, Cp) -> (tile_m//8, 8, Cp): leading-axis reduction lowers to
    # plain VPU adds on (8, Cp) vreg slabs (no per-step XLU reduce).
    tm, cp = y.shape
    y3 = y.reshape(tm // 8, 8, cp)
    sum_ref[...] += jnp.sum(y3, axis=0)
    sq_ref[...] += jnp.sum(y3 * y3, axis=0)


# -----------------------------------------------------------------------------
# Pass 2: pure elementwise BN affine + ReLU over the spilled bf16 y (mem-bound).
# -----------------------------------------------------------------------------
def bn_relu_kernel(y_ref, scale_ref, shift_ref, o_ref):
    y = y_ref[...].astype(jnp.float32)
    o_ref[...] = jnp.maximum(y * scale_ref[...] + shift_ref[...], 0.0).astype(o_ref.dtype)


def conv_bn_relu_nhwc(x, weight, gamma, beta, *, tile_m=512):
    """One Conv2d(valid, stride 1) -> BatchNorm2d(train) -> ReLU layer.

    x:      (N, H, W, Cin) float32 or bfloat16, NHWC
    weight: (Cout, Cin, K, K)  (PyTorch Conv2d layout)
    gamma, beta: (Cout,)       (BatchNorm affine)
    returns (N, Ho, Wo, Cout) bfloat16, NHWC
    """
    n, h, w, cin = x.shape
    cout, _, k, _ = weight.shape
    ho, wo = h - k + 1, w - k + 1
    m = n * ho * wo
    kdim = cin * k * k

    # Padded GEMM dims: 128-aligned contraction, lane-dense output channels.
    kp = _round_up(kdim, 128)
    cp = _round_up(cout, 128)
    # Padded M must tile evenly across (stats shards) x (M tiles per shard).
    mp = _round_up(m, tile_m * _STATS_SHARDS)
    tiles_per_shard = mp // (tile_m * _STATS_SHARDS)

    # im2col in NHWC, (kh, kw, cin) patch-feature order.  Cast to bf16 BEFORE
    # replicating K*K shifted views so the (mp, kp) intermediate is bf16.
    # TODO(synk): kill this host-side im2col via manual DMA + in-kernel
    # shifted patch construction (memory_space=pl.ANY).
    xb = x.astype(jnp.bfloat16)
    cols = [xb[:, dh:dh + ho, dw:dw + wo, :] for dh in range(k) for dw in range(k)]
    a = jnp.concatenate(cols, axis=-1).reshape(m, kdim)
    a = jnp.pad(a, ((0, mp - m), (0, kp - kdim)))

    # Flatten weights with the matching (kh, kw, cin) ordering; zero-pad.
    wmat = jnp.transpose(weight, (2, 3, 1, 0)).reshape(kdim, cout)
    wmat = jnp.pad(wmat, ((0, kp - kdim), (0, cp - cout))).astype(jnp.bfloat16)

    # --- pass 1: GEMM + bf16 y spill + per-channel partial sums --------------
    y_flat, sum8, sq8 = pl.pallas_call(
        conv_stats_kernel,
        out_shape=(jax.ShapeDtypeStruct((mp, cp), jnp.bfloat16),
                   jax.ShapeDtypeStruct((_STATS_SHARDS * 8, cp), jnp.float32),
                   jax.ShapeDtypeStruct((_STATS_SHARDS * 8, cp), jnp.float32)),
        grid_spec=pltpu.PrefetchScalarGridSpec(
            num_scalar_prefetch=0,
            grid=(_STATS_SHARDS, tiles_per_shard),
            in_specs=[
                pl.BlockSpec((tile_m, kp),
                             lambda c, i: (c * tiles_per_shard + i, 0)),
                pl.BlockSpec((kp, cp), lambda c, i: (0, 0)),
            ],
            out_specs=[
                pl.BlockSpec((tile_m, cp),
                             lambda c, i: (c * tiles_per_shard + i, 0)),
                pl.BlockSpec((8, cp), lambda c, i: (c, 0)),
                pl.BlockSpec((8, cp), lambda c, i: (c, 0)),
            ]),
        compiler_params=pltpu.CompilerParams(
            dimension_semantics=("parallel", "arbitrary"),
            vmem_limit_bytes=_VMEM_LIMIT),
        cost_estimate=pl.CostEstimate(
            flops=2 * m * kdim * cout + 3 * m * cout,
            transcendentals=0,
            bytes_accessed=(mp * kp + kp * cp + mp * cp) * 2
                           + 2 * _STATS_SHARDS * 8 * cp * 4),
    )(a, wmat)

    # BatchNorm batch statistics.  Single 16->1 cross-sublane reduce here (off
    # the kernel's critical path).  Padded M rows contribute exactly 0 to both
    # sums (no conv bias), so dividing by the true M is exact.
    sum_c = jnp.sum(sum8, axis=0, keepdims=True)   # (1, cp)
    sq_c = jnp.sum(sq8, axis=0, keepdims=True)     # (1, cp)
    mean = sum_c / m
    var = sq_c / m - mean * mean
    inv_std = lax.rsqrt(var + BN_EPS)
    g = jnp.pad(gamma, (0, cp - cout)).reshape(1, cp)
    b = jnp.pad(beta, (0, cp - cout)).reshape(1, cp)
    scale = g * inv_std
    shift = b - mean * scale

    # --- pass 2: elementwise normalize + ReLU over the spilled y -------------
    out_flat = pl.pallas_call(
        bn_relu_kernel,
        out_shape=jax.ShapeDtypeStruct((mp, cp), jnp.bfloat16),
        grid_spec=pltpu.PrefetchScalarGridSpec(
            num_scalar_prefetch=0,
            grid=(mp // tile_m,),
            in_specs=[pl.BlockSpec((tile_m, cp), lambda i: (i, 0)),
                      pl.BlockSpec((1, cp), lambda i: (0, 0)),
                      pl.BlockSpec((1, cp), lambda i: (0, 0))],
            out_specs=pl.BlockSpec((tile_m, cp), lambda i: (i, 0))),
        compiler_params=pltpu.CompilerParams(
            dimension_semantics=("parallel",),
            vmem_limit_bytes=_VMEM_LIMIT),
        cost_estimate=pl.CostEstimate(
            flops=3 * mp * cp,
            transcendentals=0,
            bytes_accessed=mp * cp * 2 * 2 + 2 * cp * 4),
    )(y_flat, scale, shift)

    # Drop M and channel padding; stay NHWC + bf16 for the next layer.
    return out_flat[:m, :cout].reshape(n, ho, wo, cout)


def down_conv_forward(x_nchw, params, *, tile_m=512):
    # Single NCHW -> NHWC transpose at entry, NHWC -> NCHW (+ f32 cast) at exit.
    x = jnp.transpose(x_nchw, (0, 2, 3, 1))
    # Conv bias (params["b1"/"b2"]) is intentionally NOT applied: train-mode BN
    # subtracts the batch mean, which cancels a per-channel constant exactly.
    x = conv_bn_relu_nhwc(x, params["w1"], params["g1"], params["be1"], tile_m=tile_m)
    x = conv_bn_relu_nhwc(x, params["w2"], params["g2"], params["be2"], tile_m=tile_m)
    return jnp.transpose(x, (0, 3, 1, 2)).astype(jnp.float32)


def init_params(key, in_channels, out_channels, mid_channels=None, k1=5, k2=5):
    if not mid_channels:
        mid_channels = out_channels
    ks = jax.random.split(key, 8)
    fan1 = in_channels * k1 * k1
    fan2 = mid_channels * k2 * k2
    return {
        "w1": jax.random.normal(ks[0], (mid_channels, in_channels, k1, k1),
                                jnp.float32) / jnp.sqrt(fan1),
        "b1": jax.random.normal(ks[1], (mid_channels,), jnp.float32) * 0.1,
        "g1": 1.0 + 0.1 * jax.random.normal(ks[2], (mid_channels,), jnp.float32),
        "be1": 0.1 * jax.random.normal(ks[3], (mid_channels,), jnp.float32),
        "w2": jax.random.normal(ks[4], (out_channels, mid_channels, k2, k2),
                                jnp.float32) / jnp.sqrt(fan2),
        "b2": jax.random.normal(ks[5], (out_channels,), jnp.float32) * 0.1,
        "g2": 1.0 + 0.1 * jax.random.normal(ks[6], (out_channels,), jnp.float32),
        "be2": 0.1 * jax.random.normal(ks[7], (out_channels,), jnp.float32),
    }


def _ref_forward(x, params):
    """Plain-JAX NCHW reference (with conv bias, train-mode BN, ReLU)."""
    def layer(x, w, b, g, be):
        y = lax.conv_general_dilated(x, w, (1, 1), "VALID",
                                     dimension_numbers=("NCHW", "OIHW", "NCHW"))
        y = y + b.reshape(1, -1, 1, 1)
        mean = jnp.mean(y, axis=(0, 2, 3), keepdims=True)
        var = jnp.mean((y - mean) ** 2, axis=(0, 2, 3), keepdims=True)
        y = (y - mean) * lax.rsqrt(var + BN_EPS) * g.reshape(1, -1, 1, 1) \
            + be.reshape(1, -1, 1, 1)
        return jnp.maximum(y, 0.0)

    x = layer(x, params["w1"], params["b1"], params["g1"], params["be1"])
    x = layer(x, params["w2"], params["b2"], params["g2"], params["be2"])
    return x


if __name__ == "__main__":
    key = jax.random.PRNGKey(0)
    k_x, k_p = jax.random.split(key)

    N, Cin, H, W = 2, 4, 16, 16
    Cout = 8
    x = jax.random.normal(k_x, (N, Cin, H, W), jnp.float32)
    params = init_params(k_p, in_channels=Cin, out_channels=Cout)

    # Small tile_m so the toy shapes still exercise a multi-step, multi-shard
    # grid with cross-tile BN accumulation (layer 1: M=288 -> mp=512 -> 2
    # shards x 2 tiles of 128).
    fwd = jax.jit(functools.partial(down_conv_forward, tile_m=128))
    out = fwd(x, params)
    jax.block_until_ready(out)

    # Shape: (N, Cout, 16-4-4, 16-4-4) = (2, 8, 8, 8)
    assert out.shape == (N, Cout, 8, 8), out.shape

    # Numerical parity vs the f32 reference (also validates that dropping the
    # conv bias under train-mode BN is exact); loose tol for bf16 GEMM inputs
    # and bf16 activation spill/output.
    ref = _ref_forward(x, params)
    err = float(jnp.max(jnp.abs(out - ref)))
    assert err < 0.1, err

    print("KERNEL_OK")
</pallas_src>

<mosaic_0001>
module attributes {stable_mosaic.version = 11 : i64} {
  func.func @conv_stats_kernel(%arg0: i32, %arg1: i32, %arg2: memref<128x128xbf16, #tpu.memory_space<vmem>>, %arg3: memref<128x128xbf16, #tpu.memory_space<vmem>>, %arg4: memref<128x128xbf16, #tpu.memory_space<vmem>>, %arg5: memref<8x128xf32, #tpu.memory_space<vmem>>, %arg6: memref<8x128xf32, #tpu.memory_space<vmem>>) attributes {dimension_semantics = [#tpu.dimension_semantics<parallel>, #tpu.dimension_semantics<arbitrary>], iteration_bounds = array<i64: 2, 2>, scalar_prefetch = 0 : i64, scratch_operands = 0 : i64, tpu.core_type = #tpu.core_type<tc>, window_params = [{transform_indices = @transform_0, window_bounds = array<i64: 128, 128>}, {pipeline_mode = #tpu.pipeline_mode<synchronous>, transform_indices = @transform_1, window_bounds = array<i64: 128, 128>}, {transform_indices = @transform_2, window_bounds = array<i64: 128, 128>}, {transform_indices = @transform_3, window_bounds = array<i64: 8, 128>}, {transform_indices = @transform_4, window_bounds = array<i64: 8, 128>}]} {
    %c0_i32 = arith.constant 0 : i32
    %0 = arith.cmpi eq, %arg1, %c0_i32 : i32
    %1 = arith.extui %0 : i1 to i32
    %c0_i32_0 = arith.constant 0 : i32
    %2 = arith.cmpi ne, %1, %c0_i32_0 : i32
    scf.if %2 {
      %cst_16 = arith.constant 0.000000e+00 : f32
      %18 = vector.broadcast %cst_16 : f32 to vector<8x128xf32>
      %c0_17 = arith.constant 0 : index
      %c0_18 = arith.constant 0 : index
      %19 = vector.load %arg5[%c0_17, %c0_18] : memref<8x128xf32, #tpu.memory_space<vmem>>, vector<8x128xf32>
      tpu.vector_store %arg5[%c0_17, %c0_18], %18 {strides = array<i32>} : memref<8x128xf32, #tpu.memory_space<vmem>>, vector<8x128xf32>,
      %cst_19 = arith.constant 0.000000e+00 : f32
      %20 = vector.broadcast %cst_19 : f32 to vector<8x128xf32>
      %c0_20 = arith.constant 0 : index
      %c0_21 = arith.constant 0 : index
      %21 = vector.load %arg6[%c0_20, %c0_21] : memref<8x128xf32, #tpu.memory_space<vmem>>, vector<8x128xf32>
      tpu.vector_store %arg6[%c0_20, %c0_21], %20 {strides = array<i32>} : memref<8x128xf32, #tpu.memory_space<vmem>>, vector<8x128xf32>,
    } else {
    }
    %c0 = arith.constant 0 : index
    %c0_1 = arith.constant 0 : index
    %3 = vector.load %arg2[%c0, %c0_1] : memref<128x128xbf16, #tpu.memory_space<vmem>>, vector<128x128xbf16>
    %c0_2 = arith.constant 0 : index
    %c0_3 = arith.constant 0 : index
    %4 = vector.load %arg3[%c0_2, %c0_3] : memref<128x128xbf16, #tpu.memory_space<vmem>>, vector<128x128xbf16>
    %cst = arith.constant dense<0.000000e+00> : vector<128x128xf32>
    %5 = tpu.matmul %3, %4, %cst {dimension_numbers = #tpu.dot_dimension_numbers<[1], [0], [0], [1], [0, 0, 1, 1], [], []>} : vector<128x128xbf16>, vector<128x128xbf16>, vector<128x128xf32> -> vector<128x128xf32>
    %6 = arith.truncf %5 : vector<128x128xf32> to vector<128x128xbf16>
    %c0_4 = arith.constant 0 : index
    %c0_5 = arith.constant 0 : index
    %7 = vector.load %arg4[%c0_4, %c0_5] : memref<128x128xbf16, #tpu.memory_space<vmem>>, vector<128x128xbf16>
    tpu.vector_store %arg4[%c0_4, %c0_5], %6 {strides = array<i32>} : memref<128x128xbf16, #tpu.memory_space<vmem>>, vector<128x128xbf16>,
    %8 = vector.shape_cast %5 : vector<128x128xf32> to vector<16x8x128xf32>
    %c0_6 = arith.constant 0 : index
    %c0_7 = arith.constant 0 : index
    %9 = vector.load %arg5[%c0_6, %c0_7] : memref<8x128xf32, #tpu.memory_space<vmem>>, vector<8x128xf32>
    %cst_8 = arith.constant dense<0.000000e+00> : vector<8x128xf32>
    %10 = vector.multi_reduction <add>, %8, %cst_8 [0] : vector<16x8x128xf32> to vector<8x128xf32>
    %11 = arith.addf %9, %10 : vector<8x128xf32>
    %c0_9 = arith.constant 0 : index
    %c0_10 = arith.constant 0 : index
    %12 = vector.load %arg5[%c0_9, %c0_10] : memref<8x128xf32, #tpu.memory_space<vmem>>, vector<8x128xf32>
    tpu.vector_store %arg5[%c0_9, %c0_10], %11 {strides = array<i32>} : memref<8x128xf32, #tpu.memory_space<vmem>>, vector<8x128xf32>,
    %c0_11 = arith.constant 0 : index
    %c0_12 = arith.constant 0 : index
    %13 = vector.load %arg6[%c0_11, %c0_12] : memref<8x128xf32, #tpu.memory_space<vmem>>, vector<8x128xf32>
    %14 = arith.mulf %8, %8 : vector<16x8x128xf32>
    %cst_13 = arith.constant dense<0.000000e+00> : vector<8x128xf32>
    %15 = vector.multi_reduction <add>, %14, %cst_13 [0] : vector<16x8x128xf32> to vector<8x128xf32>
    %16 = arith.addf %13, %15 : vector<8x128xf32>
    %c0_14 = arith.constant 0 : index
    %c0_15 = arith.constant 0 : index
    %17 = vector.load %arg6[%c0_14, %c0_15] : memref<8x128xf32, #tpu.memory_space<vmem>>, vector<8x128xf32>
    tpu.vector_store %arg6[%c0_14, %c0_15], %16 {strides = array<i32>} : memref<8x128xf32, #tpu.memory_space<vmem>>, vector<8x128xf32>,
    return
  }
  func.func @transform_0(%arg0: i32, %arg1: i32) -> (i32, i32) {
    %c2_i32 = arith.constant 2 : i32
    %0 = arith.muli %arg0, %c2_i32 : i32
    %1 = arith.addi %0, %arg1 : i32
    %c0_i32 = arith.constant 0 : i32
    %c0_i32_0 = arith.constant 0 : i32
    return %1, %c0_i32 : i32, i32
  }
  func.func @transform_1(%arg0: i32, %arg1: i32) -> (i32, i32) {
    %c0_i32 = arith.constant 0 : i32
    %c0_i32_0 = arith.constant 0 : i32
    %c0_i32_1 = arith.constant 0 : i32
    return %c0_i32, %c0_i32_0 : i32, i32
  }
  func.func @transform_2(%arg0: i32, %arg1: i32) -> (i32, i32) {
    %c2_i32 = arith.constant 2 : i32
    %0 = arith.muli %arg0, %c2_i32 : i32
    %1 = arith.addi %0, %arg1 : i32
    %c0_i32 = arith.constant 0 : i32
    %c0_i32_0 = arith.constant 0 : i32
    return %1, %c0_i32 : i32, i32
  }
  func.func @transform_3(%arg0: i32, %arg1: i32) -> (i32, i32) {
    %c0_i32 = arith.constant 0 : i32
    %c0_i32_0 = arith.constant 0 : i32
    return %arg0, %c0_i32 : i32, i32
  }
  func.func @transform_4(%arg0: i32, %arg1: i32) -> (i32, i32) {
    %c0_i32 = arith.constant 0 : i32
    %c0_i32_0 = arith.constant 0 : i32
    return %arg0, %c0_i32 : i32, i32
  }
}

module attributes {stable_mosaic.version = 11 : i64} {
  func.func @bn_relu_kernel(%arg0: i32, %arg1: memref<128x128xbf16, #tpu.memory_space<vmem>>, %arg2: memref<1x128xf32, #tpu.memory_space<vmem>>, %arg3: memref<1x128xf32, #tpu.memory_space<vmem>>, %arg4: memref<128x128xbf16, #tpu.memory_space<vmem>>) attributes {dimension_semantics = [#tpu.dimension_semantics<parallel>], iteration_bounds = array<i64: 4>, scalar_prefetch = 0 : i64, scratch_operands = 0 : i64, tpu.core_type = #tpu.core_type<tc>, window_params = [{transform_indices = @transform_0, window_bounds = array<i64: 128, 128>}, {pipeline_mode = #tpu.pipeline_mode<synchronous>, transform_indices = @transform_1, window_bounds = array<i64: 1, 128>}, {pipeline_mode = #tpu.pipeline_mode<synchronous>, transform_indices = @transform_2, window_bounds = array<i64: 1, 128>}, {transform_indices = @transform_3, window_bounds = array<i64: 128, 128>}]} {
    %c0 = arith.constant 0 : index
    %c0_0 = arith.constant 0 : index
    %0 = vector.load %arg1[%c0, %c0_0] : memref<128x128xbf16, #tpu.memory_space<vmem>>, vector<128x128xbf16>
    %1 = arith.extf %0 : vector<128x128xbf16> to vector<128x128xf32>
    %c0_1 = arith.constant 0 : index
    %c0_2 = arith.constant 0 : index
    %2 = vector.load %arg2[%c0_1, %c0_2] : memref<1x128xf32, #tpu.memory_space<vmem>>, vector<1x128xf32>
    %3 = vector.broadcast %2 : vector<1x128xf32> to vector<128x128xf32>
    %4 = arith.mulf %1, %3 : vector<128x128xf32>
    %c0_3 = arith.constant 0 : index
    %c0_4 = arith.constant 0 : index
    %5 = vector.load %arg3[%c0_3, %c0_4] : memref<1x128xf32, #tpu.memory_space<vmem>>, vector<1x128xf32>
    %6 = vector.broadcast %5 : vector<1x128xf32> to vector<128x128xf32>
    %7 = arith.addf %4, %6 : vector<128x128xf32>
    %cst = arith.constant 0.000000e+00 : f32
    %8 = vector.broadcast %cst : f32 to vector<128x128xf32>
    %9 = arith.maximumf %7, %8 : vector<128x128xf32>
    %10 = arith.truncf %9 : vector<128x128xf32> to vector<128x128xbf16>
    %c0_5 = arith.constant 0 : index
    %c0_6 = arith.constant 0 : index
    %11 = vector.load %arg4[%c0_5, %c0_6] : memref<128x128xbf16, #tpu.memory_space<vmem>>, vector<128x128xbf16>
    tpu.vector_store %arg4[%c0_5, %c0_6], %10 {strides = array<i32>} : memref<128x128xbf16, #tpu.memory_space<vmem>>, vector<128x128xbf16>,
    return
  }
  func.func @transform_0(%arg0: i32) -> (i32, i32) {
    %c0_i32 = arith.constant 0 : i32
    %c0_i32_0 = arith.constant 0 : i32
    return %arg0, %c0_i32 : i32, i32
  }
  func.func @transform_1(%arg0: i32) -> (i32, i32) {
    %c0_i32 = arith.constant 0 : i32
    %c0_i32_0 = arith.constant 0 : i32
    %c0_i32_1 = arith.constant 0 : i32
    return %c0_i32, %c0_i32_0 : i32, i32
  }
  func.func @transform_2(%arg0: i32) -> (i32, i32) {
    %c0_i32 = arith.constant 0 : i32
    %c0_i32_0 = arith.constant 0 : i32
    %c0_i32_1 = arith.constant 0 : i32
    return %c0_i32, %c0_i32_0 : i32, i32
  }
  func.func @transform_3(%arg0: i32) -> (i32, i32) {
    %c0_i32 = arith.constant 0 : i32
    %c0_i32_0 = arith.constant 0 : i32
    return %arg0, %c0_i32 : i32, i32
  }
}

module attributes {stable_mosaic.version = 11 : i64} {
  func.func @conv_stats_kernel(%arg0: i32, %arg1: i32, %arg2: memref<128x256xbf16, #tpu.memory_space<vmem>>, %arg3: memref<256x128xbf16, #tpu.memory_space<vmem>>, %arg4: memref<128x128xbf16, #tpu.memory_space<vmem>>, %arg5: memref<8x128xf32, #tpu.memory_space<vmem>>, %arg6: memref<8x128xf32, #tpu.memory_space<vmem>>) attributes {dimension_semantics = [#tpu.dimension_semantics<parallel>, #tpu.dimension_semantics<arbitrary>], iteration_bounds = array<i64: 2, 1>, scalar_prefetch = 0 : i64, scratch_operands = 0 : i64, tpu.core_type = #tpu.core_type<tc>, window_params = [{transform_indices = @transform_0, window_bounds = array<i64: 128, 256>}, {pipeline_mode = #tpu.pipeline_mode<synchronous>, transform_indices = @transform_1, window_bounds = array<i64: 256, 128>}, {transform_indices = @transform_2, window_bounds = array<i64: 128, 128>}, {transform_indices = @transform_3, window_bounds = array<i64: 8, 128>}, {transform_indices = @transform_4, window_bounds = array<i64: 8, 128>}]} {
    %c0_i32 = arith.constant 0 : i32
    %0 = arith.cmpi eq, %arg1, %c0_i32 : i32
    %1 = arith.extui %0 : i1 to i32
    %c0_i32_0 = arith.constant 0 : i32
    %2 = arith.cmpi ne, %1, %c0_i32_0 : i32
    scf.if %2 {
      %cst_16 = arith.constant 0.000000e+00 : f32
      %18 = vector.broadcast %cst_16 : f32 to vector<8x128xf32>
      %c0_17 = arith.constant 0 : index
      %c0_18 = arith.constant 0 : index
      %19 = vector.load %arg5[%c0_17, %c0_18] : memref<8x128xf32, #tpu.memory_space<vmem>>, vector<8x128xf32>
      tpu.vector_store %arg5[%c0_17, %c0_18], %18 {strides = array<i32>} : memref<8x128xf32, #tpu.memory_space<vmem>>, vector<8x128xf32>,
      %cst_19 = arith.constant 0.000000e+00 : f32
      %20 = vector.broadcast %cst_19 : f32 to vector<8x128xf32>
      %c0_20 = arith.constant 0 : index
      %c0_21 = arith.constant 0 : index
      %21 = vector.load %arg6[%c0_20, %c0_21] : memref<8x128xf32, #tpu.memory_space<vmem>>, vector<8x128xf32>
      tpu.vector_store %arg6[%c0_20, %c0_21], %20 {strides = array<i32>} : memref<8x128xf32, #tpu.memory_space<vmem>>, vector<8x128xf32>,
    } else {
    }
    %c0 = arith.constant 0 : index
    %c0_1 = arith.constant 0 : index
    %3 = vector.load %arg2[%c0, %c0_1] : memref<128x256xbf16, #tpu.memory_space<vmem>>, vector<128x256xbf16>
    %c0_2 = arith.constant 0 : index
    %c0_3 = arith.constant 0 : index
    %4 = vector.load %arg3[%c0_2, %c0_3] : memref<256x128xbf16, #tpu.memory_space<vmem>>, vector<256x128xbf16>
    %cst = arith.constant dense<0.000000e+00> : vector<128x128xf32>
    %5 = tpu.matmul %3, %4, %cst {dimension_numbers = #tpu.dot_dimension_numbers<[1], [0], [0], [1], [0, 0, 1, 1], [], []>} : vector<128x256xbf16>, vector<256x128xbf16>, vector<128x128xf32> -> vector<128x128xf32>
    %6 = arith.truncf %5 : vector<128x128xf32> to vector<128x128xbf16>
    %c0_4 = arith.constant 0 : index
    %c0_5 = arith.constant 0 : index
    %7 = vector.load %arg4[%c0_4, %c0_5] : memref<128x128xbf16, #tpu.memory_space<vmem>>, vector<128x128xbf16>
    tpu.vector_store %arg4[%c0_4, %c0_5], %6 {strides = array<i32>} : memref<128x128xbf16, #tpu.memory_space<vmem>>, vector<128x128xbf16>,
    %8 = vector.shape_cast %5 : vector<128x128xf32> to vector<16x8x128xf32>
    %c0_6 = arith.constant 0 : index
    %c0_7 = arith.constant 0 : index
    %9 = vector.load %arg5[%c0_6, %c0_7] : memref<8x128xf32, #tpu.memory_space<vmem>>, vector<8x128xf32>
    %cst_8 = arith.constant dense<0.000000e+00> : vector<8x128xf32>
    %10 = vector.multi_reduction <add>, %8, %cst_8 [0] : vector<16x8x128xf32> to vector<8x128xf32>
    %11 = arith.addf %9, %10 : vector<8x128xf32>
    %c0_9 = arith.constant 0 : index
    %c0_10 = arith.constant 0 : index
    %12 = vector.load %arg5[%c0_9, %c0_10] : memref<8x128xf32, #tpu.memory_space<vmem>>, vector<8x128xf32>
    tpu.vector_store %arg5[%c0_9, %c0_10], %11 {strides = array<i32>} : memref<8x128xf32, #tpu.memory_space<vmem>>, vector<8x128xf32>,
    %c0_11 = arith.constant 0 : index
    %c0_12 = arith.constant 0 : index
    %13 = vector.load %arg6[%c0_11, %c0_12] : memref<8x128xf32, #tpu.memory_space<vmem>>, vector<8x128xf32>
    %14 = arith.mulf %8, %8 : vector<16x8x128xf32>
    %cst_13 = arith.constant dense<0.000000e+00> : vector<8x128xf32>
    %15 = vector.multi_reduction <add>, %14, %cst_13 [0] : vector<16x8x128xf32> to vector<8x128xf32>
    %16 = arith.addf %13, %15 : vector<8x128xf32>
    %c0_14 = arith.constant 0 : index
    %c0_15 = arith.constant 0 : index
    %17 = vector.load %arg6[%c0_14, %c0_15] : memref<8x128xf32, #tpu.memory_space<vmem>>, vector<8x128xf32>
    tpu.vector_store %arg6[%c0_14, %c0_15], %16 {strides = array<i32>} : memref<8x128xf32, #tpu.memory_space<vmem>>, vector<8x128xf32>,
    return
  }
  func.func @transform_0(%arg0: i32, %arg1: i32) -> (i32, i32) {
    %c1_i32 = arith.constant 1 : i32
    %0 = arith.muli %arg0, %c1_i32 : i32
    %1 = arith.addi %0, %arg1 : i32
    %c0_i32 = arith.constant 0 : i32
    %c0_i32_0 = arith.constant 0 : i32
    return %1, %c0_i32 : i32, i32
  }
  func.func @transform_1(%arg0: i32, %arg1: i32) -> (i32, i32) {
    %c0_i32 = arith.constant 0 : i32
    %c0_i32_0 = arith.constant 0 : i32
    %c0_i32_1 = arith.constant 0 : i32
    return %c0_i32, %c0_i32_0 : i32, i32
  }
  func.func @transform_2(%arg0: i32, %arg1: i32) -> (i32, i32) {
    %c1_i32 = arith.constant 1 : i32
    %0 = arith.muli %arg0, %c1_i32 : i32
    %1 = arith.addi %0, %arg1 : i32
    %c0_i32 = arith.constant 0 : i32
    %c0_i32_0 = arith.constant 0 : i32
    return %1, %c0_i32 : i32, i32
  }
  func.func @transform_3(%arg0: i32, %arg1: i32) -> (i32, i32) {
    %c0_i32 = arith.constant 0 : i32
    %c0_i32_0 = arith.constant 0 : i32
    return %arg0, %c0_i32 : i32, i32
  }
  func.func @transform_4(%arg0: i32, %arg1: i32) -> (i32, i32) {
    %c0_i32 = arith.constant 0 : i32
    %c0_i32_0 = arith.constant 0 : i32
    return %arg0, %c0_i32 : i32, i32
  }
}

module attributes {stable_mosaic.version = 11 : i64} {
  func.func @bn_relu_kernel(%arg0: i32, %arg1: memref<128x128xbf16, #tpu.memory_space<vmem>>, %arg2: memref<1x128xf32, #tpu.memory_space<vmem>>, %arg3: memref<1x128xf32, #tpu.memory_space<vmem>>, %arg4: memref<128x128xbf16, #tpu.memory_space<vmem>>) attributes {dimension_semantics = [#tpu.dimension_semantics<parallel>], iteration_bounds = array<i64: 2>, scalar_prefetch = 0 : i64, scratch_operands = 0 : i64, tpu.core_type = #tpu.core_type<tc>, window_params = [{transform_indices = @transform_0, window_bounds = array<i64: 128, 128>}, {pipeline_mode = #tpu.pipeline_mode<synchronous>, transform_indices = @transform_1, window_bounds = array<i64: 1, 128>}, {pipeline_mode = #tpu.pipeline_mode<synchronous>, transform_indices = @transform_2, window_bounds = array<i64: 1, 128>}, {transform_indices = @transform_3, window_bounds = array<i64: 128, 128>}]} {
    %c0 = arith.constant 0 : index
    %c0_0 = arith.constant 0 : index
    %0 = vector.load %arg1[%c0, %c0_0] : memref<128x128xbf16, #tpu.memory_space<vmem>>, vector<128x128xbf16>
    %1 = arith.extf %0 : vector<128x128xbf16> to vector<128x128xf32>
    %c0_1 = arith.constant 0 : index
    %c0_2 = arith.constant 0 : index
    %2 = vector.load %arg2[%c0_1, %c0_2] : memref<1x128xf32, #tpu.memory_space<vmem>>, vector<1x128xf32>
    %3 = vector.broadcast %2 : vector<1x128xf32> to vector<128x128xf32>
    %4 = arith.mulf %1, %3 : vector<128x128xf32>
    %c0_3 = arith.constant 0 : index
    %c0_4 = arith.constant 0 : index
    %5 = vector.load %arg3[%c0_3, %c0_4] : memref<1x128xf32, #tpu.memory_space<vmem>>, vector<1x128xf32>
    %6 = vector.broadcast %5 : vector<1x128xf32> to vector<128x128xf32>
    %7 = arith.addf %4, %6 : vector<128x128xf32>
    %cst = arith.constant 0.000000e+00 : f32
    %8 = vector.broadcast %cst : f32 to vector<128x128xf32>
    %9 = arith.maximumf %7, %8 : vector<128x128xf32>
    %10 = arith.truncf %9 : vector<128x128xf32> to vector<128x128xbf16>
    %c0_5 = arith.constant 0 : index
    %c0_6 = arith.constant 0 : index
    %11 = vector.load %arg4[%c0_5, %c0_6] : memref<128x128xbf16, #tpu.memory_space<vmem>>, vector<128x128xbf16>
    tpu.vector_store %arg4[%c0_5, %c0_6], %10 {strides = array<i32>} : memref<128x128xbf16, #tpu.memory_space<vmem>>, vector<128x128xbf16>,
    return
  }
  func.func @transform_0(%arg0: i32) -> (i32, i32) {
    %c0_i32 = arith.constant 0 : i32
    %c0_i32_0 = arith.constant 0 : i32
    return %arg0, %c0_i32 : i32, i32
  }
  func.func @transform_1(%arg0: i32) -> (i32, i32) {
    %c0_i32 = arith.constant 0 : i32
    %c0_i32_0 = arith.constant 0 : i32
    %c0_i32_1 = arith.constant 0 : i32
    return %c0_i32, %c0_i32_0 : i32, i32
  }
  func.func @transform_2(%arg0: i32) -> (i32, i32) {
    %c0_i32 = arith.constant 0 : i32
    %c0_i32_0 = arith.constant 0 : i32
    %c0_i32_1 = arith.constant 0 : i32
    return %c0_i32, %c0_i32_0 : i32, i32
  }
  func.func @transform_3(%arg0: i32) -> (i32, i32) {
    %c0_i32 = arith.constant 0 : i32
    %c0_i32_0 = arith.constant 0 : i32
    return %arg0, %c0_i32 : i32, i32
  }
}

</mosaic_0001>

<bundles_post_ra>
// kernel: down_conv_forward.4
= control target key start
LH: loop header
LB: loop body
LE: loop exit
PB: predicated region body
PF: predicated region fallthrough
CT: control target
= control target key end

     0   :  { %s1060_s15 = smov 0   ;;  %s1062_s16 = smov 0   ;;  %s1175_s0 = inlined_call_operand.vmem [shape: bf16[512,128], index: 0, kind: input, shape index: {}]   ;;  %s1176_s1 = inlined_call_operand.vmem [shape: bf16[128,128], index: 1, kind: input, shape index: {}]   ;;  %s1177_s2 = inlined_call_operand.vmem [shape: bf16[512,128], index: 2, kind: output, shape index: {0}]   ;;  %s1178_s3 = inlined_call_operand.vmem [shape: f32[16,128], index: 3, kind: output, shape index: {1}]   ;;  %s1179_s4 = inlined_call_operand.vmem [shape: f32[16,128], index: 4, kind: output, shape index: {2}]  }
   0x1   :  { %s1064_s17 = smov 0   ;;  %s1066_s18 = smov 0  }
   0x2   :  { %s1068_s19 = smov 0  }
   0x3 LB: > { %s24_s20 = sadd.s32 1, %s1024_s17  ;;  %s27_s21 = sadd.s32 1, %s1028_s18  ;;  %s1032_s19 = sphi %s1068_s19, %s15_s19   ;;  %s1028_s18 = sphi %s1066_s18, %s1183_s18   ;;  %s1024_s17 = sphi %s1064_s17, %s1182_s17   ;;  %s1020_s16 = sphi %s1062_s16, %s1181_s16   ;;  %s1016_s15 = sphi %s1060_s15, %s1180_s15  }
   0x4   : > { %p25_p0 = scmp.ge.s32.totalorder %s24_s20, 2  ;;  %p766_p1 = scmp.ge.s32.totalorder %s1032_s19, 1 }
   0x5   : > { %p192_p2 = scmp.lt.s32.totalorder %s1032_s19, 5 }
   0x6   : > { %s1185_s20 = smov (%p25_p0, %s24_s20), 0  ;;  %s1187_s21 = smov (!%p25_p0, %s27_s21), %s1028_s18 }
   0x7   : > { %p193_p3 = pnand %p766_p1, %p192_p2  ;;  %p29_p4 = scmp.ge.s32.totalorder %s1187_s21, 2 }
   0x8   : > { %s767_s22 = sshll.u32 (!%p193_p3), %s1020_s16, 1  ;;  %p250_p5 = scmp.lt.s32.totalorder (!%p193_p3), %s1020_s16, 1 }
   0x9   : > { %s1189_s21 = smov (%p29_p4, %s1187_s21), 0  ;;  %196 = sbr.rel (%p193_p3) target bundleno = 310 (0x136), region = 28 }
   0xa   : > { %s231_s23 = sadd.s32 (!%p193_p3), %s1016_s15, %s767_s22  ;;  %p775_p7 = scmp.ne.s32.totalorder (!%p193_p3), %s1016_s15, 0 }
   0xb   : > { %s768_s24 = sshll.u32 (!%p193_p3), %s231_s23, 4 }
   0xc   : > { %p233_p6 = scmp.lt.s32.totalorder (!%p193_p3), %s768_s24, 63 }
  0x10   : > { %s1191_s16 = smov (!%p250_p5, %s1020_s16), 1  ;;  %s1193_s24 = smov (!%p233_p6, %s768_s24), 63 }
  0x11   : > { %s773_s25 = sshll.u32 %s1191_s16, 3  ;;  %s769_s26 = sshll.u32 %s1193_s24, 2  ;;  %v1034_v0 = vmov (!%p775_p7), 0.0  }
  0x12   : > { %s1096_s29 = scalar_lea.vmem %s1178_s3, %s773_s25  ;;  %s1101_s6 = scalar_lea.vmem %s1175_s0, %s769_s26 }
  0x13   : > { %s1106_s9 = scalar_lea.vmem %s1177_s2, %s769_s26  ;;  %s1111_s12 = scalar_lea.vmem %s1179_s4, %s773_s25  ;;  %263 = vst [vmem:[%s1096_s29] sm:$0xff] (!%p775_p7), %v1034_v0 }
  0x14   : > { %262 = sbr.rel (%p775_p7) target bundleno = 27 (0x1b), region = 32  ;;  %264 = vst [vmem:[%s1111_s12] sm:$0xff] (!%p775_p7), %v1034_v0 }
  0x1b PF: > { %v978_v1 = vld [vmem:[%s1176_s1] sm:$0xff]   ;;  %v979_v2 = vld [vmem:[%s1176_s1 + $0x8] sm:$0xff]   ;;  %v980_v3 = vld [vmem:[%s1176_s1 + $0x10] sm:$0xff]  }
  0x1c   : > { %889 = vmatprep.subr.bf16.mxu0 %v978_v1  ;;  %921 = vmatprep.subr.bf16.mxu1 %v978_v1  ;;  %v981_v4 = vld [vmem:[%s1176_s1 + $0x18] sm:$0xff]   ;;  %v986_v5 = vld [vmem:[%s1101_s6] sm:$0xff]   ;;  %v983_v8 = vld [vmem:[%s1176_s1 + $0x28] sm:$0xff]  }
  0x1d   : > { %890 = vmatpush3.bf16.msra.mxu0 %v978_v1  ;;  %929 = vmatpush3.bf16.msra.mxu1 %v978_v1  ;;  %v982_v6 = vld [vmem:[%s1176_s1 + $0x20] sm:$0xff]   ;;  %v984_v9 = vld [vmem:[%s1176_s1 + $0x30] sm:$0xff]   ;;  %v985_v10 = vld [vmem:[%s1176_s1 + $0x38] sm:$0xff]  }
  0x1e   : > { %891 = vmatprep.subr.bf16.mxu0 %v979_v2  ;;  %922 = vmatprep.subr.bf16.mxu1 %v979_v2  ;;  %v990_v7 = vld [vmem:[%s1101_s6 + $0x20] sm:$0xff]   ;;  %v987_v11 = vld [vmem:[%s1101_s6 + $0x8] sm:$0xff]   ;;  %v988_v13 = vld [vmem:[%s1101_s6 + $0x10] sm:$0xff]  }
  0x1f   : > { %905 = vmatprep.mubr.bf16.mxu0 %v986_v5  ;;  %913 = vmatprep.mubr.bf16.mxu1 %v990_v7  ;;  %v991_v12 = vld [vmem:[%s1101_s6 + $0x28] sm:$0xff]   ;;  %v992_v14 = vld [vmem:[%s1101_s6 + $0x30] sm:$0xff]   ;;  %v989_v15 = vld [vmem:[%s1101_s6 + $0x18] sm:$0xff]  }
  0x20   : > { %v993_v16 = vld [vmem:[%s1101_s6 + $0x38] sm:$0xff]  }
  0x21   : > { %892 = vmatpush3.bf16.msra.mxu0 %v979_v2  ;;  %930 = vmatpush3.bf16.msra.mxu1 %v979_v2 }
  0x22   : > { %893 = vmatprep.subr.bf16.mxu0 %v980_v3  ;;  %923 = vmatprep.subr.bf16.mxu1 %v980_v3 }
  0x25   : > { %894 = vmatpush3.bf16.msra.mxu0 %v980_v3  ;;  %931 = vmatpush3.bf16.msra.mxu1 %v980_v3 }
  0x26   : > { %895 = vmatprep.subr.bf16.mxu0 %v981_v4  ;;  %924 = vmatprep.subr.bf16.mxu1 %v981_v4 }
  0x29   : > { %896 = vmatpush3.bf16.msra.mxu0 %v981_v4  ;;  %932 = vmatpush3.bf16.msra.mxu1 %v981_v4 }
  0x2a   : > { %897 = vmatprep.subr.bf16.mxu0 %v982_v6  ;;  %925 = vmatprep.subr.bf16.mxu1 %v982_v6 }
  0x2d   : > { %898 = vmatpush3.bf16.msra.mxu0 %v982_v6  ;;  %933 = vmatpush3.bf16.msra.mxu1 %v982_v6 }
  0x2e   : > { %899 = vmatprep.subr.bf16.mxu0 %v983_v8  ;;  %926 = vmatprep.subr.bf16.mxu1 %v983_v8 }
  0x31   : > { %900 = vmatpush3.bf16.msra.mxu0 %v983_v8  ;;  %934 = vmatpush3.bf16.msra.mxu1 %v983_v8 }
  0x32   : > { %901 = vmatprep.subr.bf16.mxu0 %v984_v9  ;;  %927 = vmatprep.subr.bf16.mxu1 %v984_v9 }
  0x35   : > { %902 = vmatpush3.bf16.msra.mxu0 %v984_v9  ;;  %935 = vmatpush3.bf16.msra.mxu1 %v984_v9 }
  0x36   : > { %903 = vmatprep.subr.bf16.mxu0 %v985_v10  ;;  %928 = vmatprep.subr.bf16.mxu1 %v985_v10 }
  0x39   : > { %904 = vmatpush3.bf16.msra.mxu0 %v985_v10  ;;  %936 = vmatpush3.bf16.msra.mxu1 %v985_v10 }
  0x3c   : > { %906 = vmatmul.mubr.bf16.vlgmr.msra.gmra.mrb[0].mxu0 %v987_v11  ;;  %914 = vmatmul.mubr.bf16.vlgmr.msra.gmra.mrb[0].mxu1 %v991_v12 }
  0x3d   : > { %909 = vmatprep.mubr.bf16.mxu0 %v988_v13  ;;  %917 = vmatprep.mubr.bf16.mxu1 %v992_v14 }
  0x44   : > { %910 = vmatmul.mubr.bf16.gmra.mrb[4].mxu0 %v989_v15  ;;  %918 = vmatmul.mubr.bf16.gmra.mrb[4].mxu1 %v993_v16 }
 0x10f   : > { %v907_v17 = vpop.f32.mrb[0].mxu0  ;;  %v915_v18 = vpop.f32.mrb[0].mxu1 }
 0x110   : > { %v427_v19 = vpop.f32.mrb[1].mxu0  ;;  %v459_v20 = vpop.f32.mrb[1].mxu1  ;;  %v591_v32 = vmul.f32 %v907_v17, %v907_v17  ;;  %v599_v4 = vmul.f32 %v915_v18, %v915_v18 }
 0x111   : > { %v908_v21 = vpop.f32.mrb[2].mxu0  ;;  %v916_v22 = vpop.f32.mrb[2].mxu1  ;;  %v589_v23 = vmul.f32 %v427_v19, %v427_v19  ;;  %v597_v62 = vmul.f32 %v459_v20, %v459_v20 }
 0x112   : > { %v834_v24 = vpack.c.bf16 %v908_v21, %v907_v17  ;;  %v430_v25 = vpop.f32.mrb[3].mxu0  ;;  %v854_v26 = vpack.c.bf16 %v916_v22, %v915_v18  ;;  %v462_v27 = vpop.f32.mrb[3].mxu1  ;;  %v592_v35 = vmul.f32 %v908_v21, %v908_v21  ;;  %v600_v7 = vmul.f32 %v916_v22, %v916_v22 }
 0x113   : > { %v829_v28 = vpack.c.bf16 %v430_v25, %v427_v19  ;;  %v571_v29 = vadd.f32 %v430_v25, %v427_v19  ;;  %v590_v30 = vmul.f32 %v430_v25, %v430_v25  ;;  %v849_v31 = vpack.c.bf16 %v462_v27, %v459_v20 }
 0x114   : > { %866 = vst [vmem:[%s1106_s9 + $0x8] sm:$0xff] %v834_v24   ;;  %870 = vst [vmem:[%s1106_s9 + $0x28] sm:$0xff] %v854_v26   ;;  %v598_v3 = vmul.f32 %v462_v27, %v462_v27  ;;  %v588_v24 = vld [vmem:[%s1111_s12] sm:$0xff] }
 0x115   : > { %830 = vst [vmem:[%s1106_s9] sm:$0xff] %v829_v28   ;;  %v572_v33 = vadd.f32 %v907_v17, %v571_v29  ;;  %v605_v34 = vadd.f32 %v590_v30, %v589_v23  ;;  %869 = vst [vmem:[%s1106_s9 + $0x20] sm:$0xff] %v849_v31  }
 0x117   : > { %v606_v36 = vadd.f32 %v605_v34, %v591_v32  ;;  %v911_v37 = vpop.f32.mrb[4].mxu0  ;;  %v573_v38 = vadd.f32 %v908_v21, %v572_v33  ;;  %v919_v39 = vpop.f32.mrb[4].mxu1 }
 0x118   : > { %v443_v40 = vpop.f32.mrb[5].mxu0  ;;  %v475_v41 = vpop.f32.mrb[5].mxu1  ;;  %v595_v56 = vmul.f32 %v911_v37, %v911_v37  ;;  %v603_v16 = vmul.f32 %v919_v39, %v919_v39 }
 0x119   : > { %v574_v42 = vadd.f32 %v573_v38, %v443_v40  ;;  %v593_v43 = vmul.f32 %v443_v40, %v443_v40  ;;  %v607_v44 = vadd.f32 %v606_v36, %v592_v35  ;;  %v912_v45 = vpop.f32.mrb[6].mxu0  ;;  %v920_v46 = vpop.f32.mrb[6].mxu1  ;;  %v601_v10 = vmul.f32 %v475_v41, %v475_v41 }
 0x11a   : > { %v844_v47 = vpack.c.bf16 %v912_v45, %v911_v37  ;;  %v446_v48 = vpop.f32.mrb[7].mxu0  ;;  %v864_v49 = vpack.c.bf16 %v920_v46, %v919_v39  ;;  %v478_v50 = vpop.f32.mrb[7].mxu1  ;;  %v596_v59 = vmul.f32 %v912_v45, %v912_v45  ;;  %v604_v21 = vmul.f32 %v920_v46, %v920_v46 }
 0x11b   : > { %v608_v51 = vadd.f32 %v607_v44, %v593_v43  ;;  %v839_v52 = vpack.c.bf16 %v446_v48, %v443_v40  ;;  %v575_v53 = vadd.f32 %v574_v42, %v446_v48  ;;  %v594_v54 = vmul.f32 %v446_v48, %v446_v48 }
 0x11c   : > { %868 = vst [vmem:[%s1106_s9 + $0x18] sm:$0xff] %v844_v47   ;;  %872 = vst [vmem:[%s1106_s9 + $0x38] sm:$0xff] %v864_v49   ;;  %v859_v55 = vpack.c.bf16 %v478_v50, %v475_v41  ;;  %v602_v15 = vmul.f32 %v478_v50, %v478_v50 }
 0x11d   : > { %867 = vst [vmem:[%s1106_s9 + $0x10] sm:$0xff] %v839_v52   ;;  %v576_v57 = vadd.f32 %v911_v37, %v575_v53  ;;  %v609_v58 = vadd.f32 %v608_v51, %v594_v54 }
 0x11e   : > { %871 = vst [vmem:[%s1106_s9 + $0x30] sm:$0xff] %v859_v55  }
 0x11f   : > { %v610_v60 = vadd.f32 %v609_v58, %v595_v56  ;;  %v577_v61 = vadd.f32 %v912_v45, %v576_v57 }
 0x121   : > { %v578_v63 = vadd.f32 %v577_v61, %v459_v20  ;;  %v611_v0 = vadd.f32 %v610_v60, %v596_v59  ;;  %v570_v20 = vld [vmem:[%s1096_s29] sm:$0xff] }
 0x123   : > { %v612_v1 = vadd.f32 %v611_v0, %v597_v62  ;;  %v579_v2 = vadd.f32 %v578_v63, %v462_v27 }
 0x125   : > { %v580_v5 = vadd.f32 %v915_v18, %v579_v2  ;;  %v613_v6 = vadd.f32 %v612_v1, %v598_v3 }
 0x127   : > { %v614_v8 = vadd.f32 %v613_v6, %v599_v4  ;;  %v581_v9 = vadd.f32 %v916_v22, %v580_v5 }
 0x129   : > { %v582_v11 = vadd.f32 %v581_v9, %v475_v41  ;;  %v615_v12 = vadd.f32 %v614_v8, %v600_v7 }
 0x12b   : > { %v616_v13 = vadd.f32 %v615_v12, %v601_v10  ;;  %v583_v14 = vadd.f32 %v582_v11, %v478_v50 }
 0x12d   : > { %v584_v17 = vadd.f32 %v919_v39, %v583_v14  ;;  %v617_v19 = vadd.f32 %v616_v13, %v602_v15 }
 0x12f   : > { %v585_v23 = vadd.f32 %v920_v46, %v584_v17  ;;  %v618_v18 = vadd.f32 %v617_v19, %v603_v16 }
 0x131   : > { %v586_v25 = vadd.f32 %v585_v23, %v570_v20  ;;  %v619_v26 = vadd.f32 %v618_v18, %v604_v21 }
 0x133   : > { %587 = vst [vmem:[%s1096_s29] sm:$0xff] %v586_v25  ;;  %v620_v22 = vadd.f32 %v619_v26, %v588_v24 }
 0x135   : > { %621 = vst [vmem:[%s1111_s12] sm:$0xff] %v620_v22 }
 0x136 PF: > { %s15_s19 = sadd.s32 1, %s1032_s19   ;;  %s1180_s15 = smov %s1024_s17 }
 0x137   : > { %p12_p8 = scmp.ge.s32.totalorder %s15_s19, 6   ;;  %s1181_s16 = smov %s1028_s18 }
 0x138   : > { %s1182_s17 = smov %s1185_s20  ;;  %s1183_s18 = smov %s1189_s21 }
 0x139   :  { %14 = sbr.rel (!%p12_p8) target bundleno = 3 (0x3), region = 86 }

// kernel: down_conv_forward.5
= control target key start
LH: loop header
LB: loop body
LE: loop exit
PB: predicated region body
PF: predicated region fallthrough
CT: control target
= control target key end

     0   :  { %s571_s12 = smov 0   ;;  %s657_s0 = inlined_call_operand.vmem [shape: bf16[512,128], index: 0, kind: input, shape index: {}]   ;;  %s658_s1 = inlined_call_operand.vmem [shape: f32[1,128], index: 1, kind: input, shape index: {}]   ;;  %s659_s2 = inlined_call_operand.vmem [shape: f32[1,128], index: 2, kind: input, shape index: {}]   ;;  %s660_s3 = inlined_call_operand.vmem [shape: bf16[512,128], index: 3, kind: output, shape index: {}]  }
   0x1 LB: > { %s404_s13 = sadd.s32 4294967295, %s549_s12   ;;  %p408_p0 = scmp.ge.s32.totalorder %s549_s12, 1  ;;  %s549_s12 = sphi %s571_s12, %s13_s12  }
   0x2   : > { %p138_p1 = scmp.lt.s32.totalorder %s549_s12, 5 }
   0x4   : > { %p139_p2 = pnand %p408_p0, %p138_p1 }
   0x5   : > { %s409_s14 = sshll.u32 (!%p139_p2), %s404_s13, 4  ;;  %v592_v0 = vld [vmem:[%s658_s1] ss:$0 sm:$0xff] (!%p139_p2) }
   0x6   : > { %142 = sbr.rel (%p139_p2) target bundleno = 39 (0x27), region = 32  ;;  %p163_p3 = scmp.lt.s32.totalorder (!%p139_p2), %s409_s14, 63  ;;  %v601_v9 = vld [vmem:[%s659_s2] ss:$0 sm:$0xff] (!%p139_p2) }
   0xd   : > { %s662_s14 = smov (!%p163_p3, %s409_s14), 63 }
   0xe   : > { %s410_s15 = sshll.u32 %s662_s14, 2 }
   0xf   : > { %s587_s18 = scalar_lea.vmem %s657_s0, %s410_s15  ;;  %s626_s25 = scalar_lea.vmem %s660_s3, %s410_s15 }
  0x10   : > { %v450_v1 = vld [vmem:[%s587_s18] sm:$0xff]   ;;  %v521_v2 = vld [vmem:[%s587_s18 + $0x8] sm:$0xff]   ;;  %v522_v3 = vld [vmem:[%s587_s18 + $0x10] sm:$0xff]  }
  0x11   : > { %v451_v4 = vunpack.c.l.bf16 %v450_v1  ;;  %v452_v5 = vunpack.c.h.bf16 %v450_v1  ;;  %v455_v6 = vunpack.c.l.bf16 %v521_v2  ;;  %v456_v7 = vunpack.c.h.bf16 %v521_v2  ;;  %v523_v8 = vld [vmem:[%s587_s18 + $0x18] sm:$0xff]   ;;  %v524_v30 = vld [vmem:[%s587_s18 + $0x20] sm:$0xff]   ;;  %v525_v35 = vld [vmem:[%s587_s18 + $0x28] sm:$0xff]  }
  0x12   : > { %v459_v10 = vunpack.c.l.bf16 %v522_v3  ;;  %v460_v11 = vunpack.c.h.bf16 %v522_v3  ;;  %v463_v12 = vunpack.c.l.bf16 %v523_v8  ;;  %v464_v13 = vunpack.c.h.bf16 %v523_v8  ;;  %v526_v40 = vld [vmem:[%s587_s18 + $0x30] sm:$0xff]   ;;  %v527_v45 = vld [vmem:[%s587_s18 + $0x38] sm:$0xff]  }
  0x13   : > { %v213_v14 = vmul.f32 %v451_v4, %v592_v0  ;;  %v214_v15 = vmul.f32 %v452_v5, %v592_v0  ;;  %v215_v16 = vmul.f32 %v455_v6, %v592_v0  ;;  %v216_v17 = vmul.f32 %v456_v7, %v592_v0 }
  0x14   : > { %v217_v18 = vmul.f32 %v459_v10, %v592_v0  ;;  %v218_v19 = vmul.f32 %v460_v11, %v592_v0  ;;  %v219_v20 = vmul.f32 %v463_v12, %v592_v0  ;;  %v220_v21 = vmul.f32 %v464_v13, %v592_v0 }
  0x15   : > { %v236_v22 = vadd.f32 %v601_v9, %v213_v14  ;;  %v237_v23 = vadd.f32 %v601_v9, %v214_v15  ;;  %v238_v24 = vadd.f32 %v601_v9, %v215_v16  ;;  %v239_v25 = vadd.f32 %v601_v9, %v216_v17 }
  0x16   : > { %v240_v26 = vadd.f32 %v601_v9, %v217_v18  ;;  %v241_v27 = vadd.f32 %v601_v9, %v218_v19  ;;  %v242_v28 = vadd.f32 %v601_v9, %v219_v20  ;;  %v243_v29 = vadd.f32 %v601_v9, %v220_v21 }
  0x17   : > { %v252_v31 = vmax.f32 %v236_v22, 0.0  ;;  %v253_v32 = vmax.f32 %v237_v23, 0.0  ;;  %v254_v33 = vmax.f32 %v238_v24, 0.0  ;;  %v255_v34 = vmax.f32 %v239_v25, 0.0 }
  0x18   : > { %v256_v36 = vmax.f32 %v240_v26, 0.0  ;;  %v257_v37 = vmax.f32 %v241_v27, 0.0  ;;  %v258_v38 = vmax.f32 %v242_v28, 0.0  ;;  %v259_v39 = vmax.f32 %v243_v29, 0.0 }
  0x19   : > { %v484_v41 = vpack.c.bf16 %v253_v32, %v252_v31  ;;  %v489_v42 = vpack.c.bf16 %v255_v34, %v254_v33  ;;  %v467_v43 = vunpack.c.l.bf16 %v524_v30  ;;  %v468_v44 = vunpack.c.h.bf16 %v524_v30 }
  0x1a   : > { %v494_v46 = vpack.c.bf16 %v257_v37, %v256_v36  ;;  %v499_v47 = vpack.c.bf16 %v259_v39, %v258_v38  ;;  %v471_v48 = vunpack.c.l.bf16 %v525_v35  ;;  %v472_v49 = vunpack.c.h.bf16 %v525_v35 }
  0x1b   : > { %485 = vst [vmem:[%s626_s25] sm:$0xff] %v484_v41   ;;  %528 = vst [vmem:[%s626_s25 + $0x8] sm:$0xff] %v489_v42   ;;  %v221_v50 = vmul.f32 %v467_v43, %v592_v0  ;;  %v222_v51 = vmul.f32 %v468_v44, %v592_v0  ;;  %v475_v52 = vunpack.c.l.bf16 %v526_v40  ;;  %v476_v53 = vunpack.c.h.bf16 %v526_v40 }
  0x1c   : > { %529 = vst [vmem:[%s626_s25 + $0x10] sm:$0xff] %v494_v46   ;;  %530 = vst [vmem:[%s626_s25 + $0x18] sm:$0xff] %v499_v47   ;;  %v223_v54 = vmul.f32 %v471_v48, %v592_v0  ;;  %v224_v55 = vmul.f32 %v472_v49, %v592_v0  ;;  %v479_v56 = vunpack.c.l.bf16 %v527_v45  ;;  %v480_v57 = vunpack.c.h.bf16 %v527_v45 }
  0x1d   : > { %v244_v58 = vadd.f32 %v601_v9, %v221_v50  ;;  %v245_v59 = vadd.f32 %v601_v9, %v222_v51  ;;  %v225_v60 = vmul.f32 %v475_v52, %v592_v0  ;;  %v226_v61 = vmul.f32 %v476_v53, %v592_v0 }
  0x1e   : > { %v246_v62 = vadd.f32 %v601_v9, %v223_v54  ;;  %v247_v63 = vadd.f32 %v601_v9, %v224_v55  ;;  %v227_v1 = vmul.f32 %v479_v56, %v592_v0  ;;  %v228_v2 = vmul.f32 %v480_v57, %v592_v0 }
  0x1f   : > { %v260_v3 = vmax.f32 %v244_v58, 0.0  ;;  %v261_v4 = vmax.f32 %v245_v59, 0.0  ;;  %v248_v5 = vadd.f32 %v601_v9, %v225_v60  ;;  %v249_v6 = vadd.f32 %v601_v9, %v226_v61 }
  0x20   : > { %v262_v7 = vmax.f32 %v246_v62, 0.0  ;;  %v263_v8 = vmax.f32 %v247_v63, 0.0  ;;  %v250_v10 = vadd.f32 %v601_v9, %v227_v1  ;;  %v251_v11 = vadd.f32 %v601_v9, %v228_v2 }
  0x21   : > { %v504_v12 = vpack.c.bf16 %v261_v4, %v260_v3  ;;  %v264_v13 = vmax.f32 %v248_v5, 0.0  ;;  %v265_v14 = vmax.f32 %v249_v6, 0.0 }
  0x22   : > { %v509_v15 = vpack.c.bf16 %v263_v8, %v262_v7  ;;  %v266_v0 = vmax.f32 %v250_v10, 0.0  ;;  %v267_v16 = vmax.f32 %v251_v11, 0.0 }
  0x23   : > { %531 = vst [vmem:[%s626_s25 + $0x20] sm:$0xff] %v504_v12   ;;  %v514_v17 = vpack.c.bf16 %v265_v14, %v264_v13 }
  0x24   : > { %532 = vst [vmem:[%s626_s25 + $0x28] sm:$0xff] %v509_v15   ;;  %v519_v18 = vpack.c.bf16 %v267_v16, %v266_v0 }
  0x25   : > { %533 = vst [vmem:[%s626_s25 + $0x30] sm:$0xff] %v514_v17  }
  0x26   : > { %534 = vst [vmem:[%s626_s25 + $0x38] sm:$0xff] %v519_v18  }
  0x27 PF: > { %s13_s12 = sadd.s32 1, %s549_s12  }
  0x28   : > { %p10_p4 = scmp.ge.s32.totalorder %s13_s12, 6  }
  0x2a   :  { %12 = sbr.rel (!%p10_p4) target bundleno = 1 (0x1), region = 62 }

// kernel: down_conv_forward.7
= control target key start
LH: loop header
LB: loop body
LE: loop exit
PB: predicated region body
PF: predicated region fallthrough
CT: control target
= control target key end

     0   :  { %s571_s12 = smov 0   ;;  %s657_s0 = inlined_call_operand.vmem [shape: bf16[256,128], index: 0, kind: input, shape index: {}]   ;;  %s658_s1 = inlined_call_operand.vmem [shape: f32[1,128], index: 1, kind: input, shape index: {}]   ;;  %s659_s2 = inlined_call_operand.vmem [shape: f32[1,128], index: 2, kind: input, shape index: {}]   ;;  %s660_s3 = inlined_call_operand.vmem [shape: bf16[256,128], index: 3, kind: output, shape index: {}]  }
   0x1 LB: > { %s404_s13 = sadd.s32 4294967295, %s549_s12   ;;  %p408_p0 = scmp.ge.s32.totalorder %s549_s12, 1  ;;  %s549_s12 = sphi %s571_s12, %s13_s12  }
   0x2   : > { %p138_p1 = scmp.lt.s32.totalorder %s549_s12, 3 }
   0x4   : > { %p139_p2 = pnand %p408_p0, %p138_p1 }
   0x5   : > { %s409_s14 = sshll.u32 (!%p139_p2), %s404_s13, 4  ;;  %v592_v0 = vld [vmem:[%s658_s1] ss:$0 sm:$0xff] (!%p139_p2) }
   0x6   : > { %142 = sbr.rel (%p139_p2) target bundleno = 39 (0x27), region = 32  ;;  %p163_p3 = scmp.lt.s32.totalorder (!%p139_p2), %s409_s14, 31  ;;  %v601_v9 = vld [vmem:[%s659_s2] ss:$0 sm:$0xff] (!%p139_p2) }
   0xd   : > { %s662_s14 = smov (!%p163_p3, %s409_s14), 31 }
   0xe   : > { %s410_s15 = sshll.u32 %s662_s14, 2 }
   0xf   : > { %s587_s18 = scalar_lea.vmem %s657_s0, %s410_s15  ;;  %s626_s25 = scalar_lea.vmem %s660_s3, %s410_s15 }
  0x10   : > { %v450_v1 = vld [vmem:[%s587_s18] sm:$0xff]   ;;  %v521_v2 = vld [vmem:[%s587_s18 + $0x8] sm:$0xff]   ;;  %v522_v3 = vld [vmem:[%s587_s18 + $0x10] sm:$0xff]  }
  0x11   : > { %v451_v4 = vunpack.c.l.bf16 %v450_v1  ;;  %v452_v5 = vunpack.c.h.bf16 %v450_v1  ;;  %v455_v6 = vunpack.c.l.bf16 %v521_v2  ;;  %v456_v7 = vunpack.c.h.bf16 %v521_v2  ;;  %v523_v8 = vld [vmem:[%s587_s18 + $0x18] sm:$0xff]   ;;  %v524_v30 = vld [vmem:[%s587_s18 + $0x20] sm:$0xff]   ;;  %v525_v35 = vld [vmem:[%s587_s18 + $0x28] sm:$0xff]  }
  0x12   : > { %v459_v10 = vunpack.c.l.bf16 %v522_v3  ;;  %v460_v11 = vunpack.c.h.bf16 %v522_v3  ;;  %v463_v12 = vunpack.c.l.bf16 %v523_v8  ;;  %v464_v13 = vunpack.c.h.bf16 %v523_v8  ;;  %v526_v40 = vld [vmem:[%s587_s18 + $0x30] sm:$0xff]   ;;  %v527_v45 = vld [vmem:[%s587_s18 + $0x38] sm:$0xff]  }
  0x13   : > { %v213_v14 = vmul.f32 %v451_v4, %v592_v0  ;;  %v214_v15 = vmul.f32 %v452_v5, %v592_v0  ;;  %v215_v16 = vmul.f32 %v455_v6, %v592_v0  ;;  %v216_v17 = vmul.f32 %v456_v7, %v592_v0 }
  0x14   : > { %v217_v18 = vmul.f32 %v459_v10, %v592_v0  ;;  %v218_v19 = vmul.f32 %v460_v11, %v592_v0  ;;  %v219_v20 = vmul.f32 %v463_v12, %v592_v0  ;;  %v220_v21 = vmul.f32 %v464_v13, %v592_v0 }
  0x15   : > { %v236_v22 = vadd.f32 %v601_v9, %v213_v14  ;;  %v237_v23 = vadd.f32 %v601_v9, %v214_v15  ;;  %v238_v24 = vadd.f32 %v601_v9, %v215_v16  ;;  %v239_v25 = vadd.f32 %v601_v9, %v216_v17 }
  0x16   : > { %v240_v26 = vadd.f32 %v601_v9, %v217_v18  ;;  %v241_v27 = vadd.f32 %v601_v9, %v218_v19  ;;  %v242_v28 = vadd.f32 %v601_v9, %v219_v20  ;;  %v243_v29 = vadd.f32 %v601_v9, %v220_v21 }
  0x17   : > { %v252_v31 = vmax.f32 %v236_v22, 0.0  ;;  %v253_v32 = vmax.f32 %v237_v23, 0.0  ;;  %v254_v33 = vmax.f32 %v238_v24, 0.0  ;;  %v255_v34 = vmax.f32 %v239_v25, 0.0 }
  0x18   : > { %v256_v36 = vmax.f32 %v240_v26, 0.0  ;;  %v257_v37 = vmax.f32 %v241_v27, 0.0  ;;  %v258_v38 = vmax.f32 %v242_v28, 0.0  ;;  %v259_v39 = vmax.f32 %v243_v29, 0.0 }
  0x19   : > { %v484_v41 = vpack.c.bf16 %v253_v32, %v252_v31  ;;  %v489_v42 = vpack.c.bf16 %v255_v34, %v254_v33  ;;  %v467_v43 = vunpack.c.l.bf16 %v524_v30  ;;  %v468_v44 = vunpack.c.h.bf16 %v524_v30 }
  0x1a   : > { %v494_v46 = vpack.c.bf16 %v257_v37, %v256_v36  ;;  %v499_v47 = vpack.c.bf16 %v259_v39, %v258_v38  ;;  %v471_v48 = vunpack.c.l.bf16 %v525_v35  ;;  %v472_v49 = vunpack.c.h.bf16 %v525_v35 }
  0x1b   : > { %485 = vst [vmem:[%s626_s25] sm:$0xff] %v484_v41   ;;  %528 = vst [vmem:[%s626_s25 + $0x8] sm:$0xff] %v489_v42   ;;  %v221_v50 = vmul.f32 %v467_v43, %v592_v0  ;;  %v222_v51 = vmul.f32 %v468_v44, %v592_v0  ;;  %v475_v52 = vunpack.c.l.bf16 %v526_v40  ;;  %v476_v53 = vunpack.c.h.bf16 %v526_v40 }
  0x1c   : > { %529 = vst [vmem:[%s626_s25 + $0x10] sm:$0xff] %v494_v46   ;;  %530 = vst [vmem:[%s626_s25 + $0x18] sm:$0xff] %v499_v47   ;;  %v223_v54 = vmul.f32 %v471_v48, %v592_v0  ;;  %v224_v55 = vmul.f32 %v472_v49, %v592_v0  ;;  %v479_v56 = vunpack.c.l.bf16 %v527_v45  ;;  %v480_v57 = vunpack.c.h.bf16 %v527_v45 }
  0x1d   : > { %v244_v58 = vadd.f32 %v601_v9, %v221_v50  ;;  %v245_v59 = vadd.f32 %v601_v9, %v222_v51  ;;  %v225_v60 = vmul.f32 %v475_v52, %v592_v0  ;;  %v226_v61 = vmul.f32 %v476_v53, %v592_v0 }
  0x1e   : > { %v246_v62 = vadd.f32 %v601_v9, %v223_v54  ;;  %v247_v63 = vadd.f32 %v601_v9, %v224_v55  ;;  %v227_v1 = vmul.f32 %v479_v56, %v592_v0  ;;  %v228_v2 = vmul.f32 %v480_v57, %v592_v0 }
  0x1f   : > { %v260_v3 = vmax.f32 %v244_v58, 0.0  ;;  %v261_v4 = vmax.f32 %v245_v59, 0.0  ;;  %v248_v5 = vadd.f32 %v601_v9, %v225_v60  ;;  %v249_v6 = vadd.f32 %v601_v9, %v226_v61 }
  0x20   : > { %v262_v7 = vmax.f32 %v246_v62, 0.0  ;;  %v263_v8 = vmax.f32 %v247_v63, 0.0  ;;  %v250_v10 = vadd.f32 %v601_v9, %v227_v1  ;;  %v251_v11 = vadd.f32 %v601_v9, %v228_v2 }
  0x21   : > { %v504_v12 = vpack.c.bf16 %v261_v4, %v260_v3  ;;  %v264_v13 = vmax.f32 %v248_v5, 0.0  ;;  %v265_v14 = vmax.f32 %v249_v6, 0.0 }
  0x22   : > { %v509_v15 = vpack.c.bf16 %v263_v8, %v262_v7  ;;  %v266_v0 = vmax.f32 %v250_v10, 0.0  ;;  %v267_v16 = vmax.f32 %v251_v11, 0.0 }
  0x23   : > { %531 = vst [vmem:[%s626_s25 + $0x20] sm:$0xff] %v504_v12   ;;  %v514_v17 = vpack.c.bf16 %v265_v14, %v264_v13 }
  0x24   : > { %532 = vst [vmem:[%s626_s25 + $0x28] sm:$0xff] %v509_v15   ;;  %v519_v18 = vpack.c.bf16 %v267_v16, %v266_v0 }
  0x25   : > { %533 = vst [vmem:[%s626_s25 + $0x30] sm:$0xff] %v514_v17  }
  0x26   : > { %534 = vst [vmem:[%s626_s25 + $0x38] sm:$0xff] %v519_v18  }
  0x27 PF: > { %s13_s12 = sadd.s32 1, %s549_s12  }
  0x28   : > { %p10_p4 = scmp.ge.s32.totalorder %s13_s12, 4  }
  0x2a   :  { %12 = sbr.rel (!%p10_p4) target bundleno = 1 (0x1), region = 62 }

// kernel: down_conv_forward.6
= control target key start
LH: loop header
LB: loop body
LE: loop exit
PB: predicated region body
PF: predicated region fallthrough
CT: control target
= control target key end

     0   :  { %s1159_s15 = smov 0   ;;  %s1161_s16 = smov 0   ;;  %s1307_s0 = inlined_call_operand.vmem [shape: bf16[256,256], index: 0, kind: input, shape index: {}]   ;;  %s1308_s1 = inlined_call_operand.vmem [shape: bf16[256,128], index: 1, kind: input, shape index: {}]   ;;  %s1309_s2 = inlined_call_operand.vmem [shape: bf16[256,128], index: 2, kind: output, shape index: {0}]   ;;  %s1310_s3 = inlined_call_operand.vmem [shape: f32[16,128], index: 3, kind: output, shape index: {1}]   ;;  %s1311_s4 = inlined_call_operand.vmem [shape: f32[16,128], index: 4, kind: output, shape index: {2}]  }
   0x1   :  { %s1163_s17 = smov 0  }
   0x2 LB: > { %s27_s18 = sadd.s32 1, %s1128_s16  ;;  %p843_p0 = scmp.ge.s32.totalorder %s1132_s17, 1  ;;  %s1132_s17 = sphi %s1163_s17, %s15_s17   ;;  %s1128_s16 = sphi %s1161_s16, %s1313_s16   ;;  %s1124_s15 = sphi %s1159_s15, %s1312_s15  }
   0x3   : > { %p29_p1 = scmp.ge.s32.totalorder %s27_s18, 2  ;;  %p187_p2 = scmp.lt.s32.totalorder %s1132_s17, 3 }
   0x5   : > { %s1315_s18 = smov (%p29_p1, %s27_s18), 0  ;;  %p188_p3 = pnand %p843_p0, %p187_p2 }
   0x6   : > { %v1070_v0 = vld [vmem:[%s1308_s1 + $0x40] sm:$0xff] (!%p188_p3)   ;;  %s844_s21 = sshll.u32 (!%p188_p3), %s1124_s15, 4  ;;  %v1072_v2 = vld [vmem:[%s1308_s1 + $0x48] sm:$0xff] (!%p188_p3)   ;;  %v1074_v4 = vld [vmem:[%s1308_s1 + $0x50] sm:$0xff] (!%p188_p3)   ;;  %p241_p5 = scmp.lt.s32.totalorder (!%p188_p3), %s1124_s15, 1 }
   0x7   : > { %191 = sbr.rel (%p188_p3) target bundleno = 301 (0x12d), region = 28  ;;  %v1071_v1 = vld [vmem:[%s1308_s1] sm:$0xff] (!%p188_p3)   ;;  %965 = vmatprep.subr.bf16.mxu0 (!%p188_p3), %v1070_v0  ;;  %1029 = vmatprep.subr.bf16.mxu1 (!%p188_p3), %v1070_v0  ;;  %v1073_v3 = vld [vmem:[%s1308_s1 + $0x8] sm:$0xff] (!%p188_p3)   ;;  %p226_p4 = scmp.lt.s32.totalorder (!%p188_p3), %s844_s21, 31  ;;  %v1075_v5 = vld [vmem:[%s1308_s1 + $0x10] sm:$0xff] (!%p188_p3)  }
   0x8   : > { %966 = vmatpush3.bf16.msra.mxu0 (!%p188_p3), %v1071_v1  ;;  %1037 = vmatpush3.bf16.msra.mxu1 (!%p188_p3), %v1071_v1  ;;  %v1076_v6 = vld [vmem:[%s1308_s1 + $0x58] sm:$0xff] (!%p188_p3)   ;;  %v1078_v8 = vld [vmem:[%s1308_s1 + $0x60] sm:$0xff] (!%p188_p3)   ;;  %v1080_v10 = vld [vmem:[%s1308_s1 + $0x68] sm:$0xff] (!%p188_p3)  }
   0x9   : > { %967 = vmatprep.subr.bf16.mxu0 (!%p188_p3), %v1072_v2  ;;  %1030 = vmatprep.subr.bf16.mxu1 (!%p188_p3), %v1072_v2  ;;  %v1077_v7 = vld [vmem:[%s1308_s1 + $0x18] sm:$0xff] (!%p188_p3)   ;;  %v1079_v9 = vld [vmem:[%s1308_s1 + $0x20] sm:$0xff] (!%p188_p3)   ;;  %v1081_v12 = vld [vmem:[%s1308_s1 + $0x28] sm:$0xff] (!%p188_p3)  }
   0xa   : > { %v1082_v14 = vld [vmem:[%s1308_s1 + $0x70] sm:$0xff] (!%p188_p3)   ;;  %v1084_v16 = vld [vmem:[%s1308_s1 + $0x78] sm:$0xff] (!%p188_p3)  }
   0xb   : > { %v1083_v15 = vld [vmem:[%s1308_s1 + $0x30] sm:$0xff] (!%p188_p3)   ;;  %v1085_v17 = vld [vmem:[%s1308_s1 + $0x38] sm:$0xff] (!%p188_p3)  }
   0xc   : > { %968 = vmatpush3.bf16.msra.mxu0 (!%p188_p3), %v1073_v3  ;;  %1038 = vmatpush3.bf16.msra.mxu1 (!%p188_p3), %v1073_v3 }
   0xd   : > { %969 = vmatprep.subr.bf16.mxu0 (!%p188_p3), %v1074_v4  ;;  %1031 = vmatprep.subr.bf16.mxu1 (!%p188_p3), %v1074_v4 }
   0xe   : > { %s1317_s21 = smov (!%p226_p4, %s844_s21), 31  ;;  %s1319_s15 = smov (!%p241_p5, %s1124_s15), 1 }
   0xf   : > { %s901_s10 = sshll.u32 %s1317_s21, 3  ;;  %s848_s9 = sshll.u32 %s1317_s21, 2 }
  0x10   : > { %970 = vmatpush3.bf16.msra.mxu0 %v1075_v5  ;;  %1039 = vmatpush3.bf16.msra.mxu1 %v1075_v5  ;;  %s1213_s19 = scalar_lea.vmem %s1307_s0, %s901_s10  ;;  %s1260_s12 = scalar_lea.vmem %s1309_s2, %s848_s9 }
  0x11   : > { %971 = vmatprep.subr.bf16.mxu0 %v1076_v6  ;;  %1032 = vmatprep.subr.bf16.mxu1 %v1076_v6  ;;  %v1088_v11 = vld [vmem:[%s1213_s19 + $0x4] ss:$8 sps:$4 sm:$0xff]   ;;  %v1086_v18 = vld [vmem:[%s1213_s19] ss:$8 sps:$4 sm:$0xff]   ;;  %v1089_v20 = vld [vmem:[%s1213_s19 + $0x14] ss:$8 sps:$4 sm:$0xff]  }
  0x12   : > { %v1094_v13 = vld [vmem:[%s1213_s19 + $0x44] ss:$8 sps:$4 sm:$0xff]   ;;  %512 = vmatprep.mubr.bf16.mxu0 %v1088_v11  ;;  %v1092_v19 = vld [vmem:[%s1213_s19 + $0x40] ss:$8 sps:$4 sm:$0xff]   ;;  %v1098_v21 = vld [vmem:[%s1213_s19 + $0x54] ss:$8 sps:$4 sm:$0xff]  }
  0x13   : > { %544 = vmatprep.mubr.bf16.mxu1 %v1094_v13  ;;  %v1091_v22 = vld [vmem:[%s1213_s19 + $0x10] ss:$8 sps:$4 sm:$0xff]   ;;  %v1095_v24 = vld [vmem:[%s1213_s19 + $0x24] ss:$8 sps:$4 sm:$0xff]   ;;  %v1097_v26 = vld [vmem:[%s1213_s19 + $0x20] ss:$8 sps:$4 sm:$0xff]  }
  0x14   : > { %972 = vmatpush3.bf16.msra.mxu0 %v1077_v7  ;;  %1040 = vmatpush3.bf16.msra.mxu1 %v1077_v7  ;;  %v1100_v23 = vld [vmem:[%s1213_s19 + $0x50] ss:$8 sps:$4 sm:$0xff]   ;;  %v1104_v25 = vld [vmem:[%s1213_s19 + $0x64] ss:$8 sps:$4 sm:$0xff]   ;;  %v1106_v27 = vld [vmem:[%s1213_s19 + $0x60] ss:$8 sps:$4 sm:$0xff]  }
  0x15   : > { %973 = vmatprep.subr.bf16.mxu0 %v1078_v8  ;;  %1033 = vmatprep.subr.bf16.mxu1 %v1078_v8  ;;  %v1101_v28 = vld [vmem:[%s1213_s19 + $0x34] ss:$8 sps:$4 sm:$0xff]   ;;  %v1103_v30 = vld [vmem:[%s1213_s19 + $0x30] ss:$8 sps:$4 sm:$0xff]   ;;  %s849_s21 = sshll.u32 %s1319_s15, 3 }
  0x16   : > { %v1107_v29 = vld [vmem:[%s1213_s19 + $0x74] ss:$8 sps:$4 sm:$0xff]   ;;  %v1109_v31 = vld [vmem:[%s1213_s19 + $0x70] ss:$8 sps:$4 sm:$0xff]   ;;  %s244_s19 = scalar_lea.vmem %s1310_s3, %s849_s21  ;;  %s248_s23 = scalar_lea.vmem %s1311_s4, %s849_s21 }
  0x18   : > { %974 = vmatpush3.bf16.msra.mxu0 %v1079_v9  ;;  %1041 = vmatpush3.bf16.msra.mxu1 %v1079_v9 }
  0x19   : > { %975 = vmatprep.subr.bf16.mxu0 %v1080_v10  ;;  %1034 = vmatprep.subr.bf16.mxu1 %v1080_v10 }
  0x1c   : > { %976 = vmatpush3.bf16.msra.mxu0 %v1081_v12  ;;  %1042 = vmatpush3.bf16.msra.mxu1 %v1081_v12 }
  0x1d   : > { %977 = vmatprep.subr.bf16.mxu0 %v1082_v14  ;;  %1035 = vmatprep.subr.bf16.mxu1 %v1082_v14 }
  0x20   : > { %978 = vmatpush3.bf16.msra.mxu0 %v1083_v15  ;;  %1043 = vmatpush3.bf16.msra.mxu1 %v1083_v15 }
  0x21   : > { %979 = vmatprep.subr.bf16.mxu0 %v1084_v16  ;;  %1036 = vmatprep.subr.bf16.mxu1 %v1084_v16 }
  0x24   : > { %980 = vmatpush3.bf16.msra.mxu0 %v1085_v17  ;;  %1044 = vmatpush3.bf16.msra.mxu1 %v1085_v17 }
  0x27   : > { %513 = vmatmul.mubr.bf16.vlgmr.msra.gmra.mrb[0].mxu0 %v1086_v18  ;;  %545 = vmatmul.mubr.bf16.vlgmr.msra.gmra.mrb[0].mxu1 %v1092_v19 }
  0x28   : > { %520 = vmatprep.mubr.bf16.mxu0 %v1089_v20  ;;  %552 = vmatprep.mubr.bf16.mxu1 %v1098_v21 }
  0x2f   : > { %521 = vmatmul.mubr.bf16.gmra.mrb[4].mxu0 %v1091_v22  ;;  %553 = vmatmul.mubr.bf16.gmra.mrb[4].mxu1 %v1100_v23 }
  0x30   : > { %528 = vmatprep.mubr.bf16.mxu0 %v1095_v24  ;;  %560 = vmatprep.mubr.bf16.mxu1 %v1104_v25 }
  0x37   : > { %529 = vmatmul.mubr.bf16.gmra.mrb[8].mxu0 %v1097_v26  ;;  %561 = vmatmul.mubr.bf16.gmra.mrb[8].mxu1 %v1106_v27 }
  0x38   : > { %536 = vmatprep.mubr.bf16.mxu0 %v1101_v28  ;;  %568 = vmatprep.mubr.bf16.mxu1 %v1107_v29 }
  0x3f   : > { %537 = vmatmul.mubr.bf16.gmra.mrb[12].mxu0 %v1103_v30  ;;  %569 = vmatmul.mubr.bf16.gmra.mrb[12].mxu1 %v1109_v31 }
  0xfa   : > { %v981_v32 = vpop.f32.mrb[0].mxu0  ;;  %v1005_v33 = vpop.f32.mrb[0].mxu1 }
  0xfb   : > { %v982_v34 = vpop.f32.mrb[1].mxu0  ;;  %v1006_v35 = vpop.f32.mrb[1].mxu1 }
  0xfc   : > { %v983_v36 = vadd.f32 %v982_v34, %v981_v32  ;;  %v984_v37 = vpop.f32.mrb[2].mxu0  ;;  %v1253_v38 = vadd.f32 %v1006_v35, %v1005_v33  ;;  %v1008_v39 = vpop.f32.mrb[2].mxu1 }
  0xfd   : > { %v985_v40 = vpop.f32.mrb[3].mxu0  ;;  %v1009_v41 = vpop.f32.mrb[3].mxu1 }
  0xfe   : > { %v986_v42 = vadd.f32 %v985_v40, %v984_v37  ;;  %v1255_v43 = vadd.f32 %v1009_v41, %v1008_v39  ;;  %v676_v44 = vmul.f32 %v983_v36, %v983_v36 }
 0x100   : > { %v921_v45 = vpack.c.bf16 %v986_v42, %v983_v36  ;;  %v658_v46 = vadd.f32 %v986_v42, %v983_v36  ;;  %v677_v47 = vmul.f32 %v986_v42, %v986_v42  ;;  %v941_v48 = vpack.c.bf16 %v1255_v43, %v1253_v38 }
 0x102   : > { %922 = vst [vmem:[%s1260_s12] sm:$0xff] %v921_v45   ;;  %v692_v49 = vadd.f32 %v677_v47, %v676_v44  ;;  %v987_v50 = vpop.f32.mrb[4].mxu0  ;;  %961 = vst [vmem:[%s1260_s12 + $0x20] sm:$0xff] %v941_v48   ;;  %v1011_v51 = vpop.f32.mrb[4].mxu1  ;;  %v684_v47 = vmul.f32 %v1253_v38, %v1253_v38 }
 0x103   : > { %v988_v52 = vpop.f32.mrb[5].mxu0  ;;  %v1012_v53 = vpop.f32.mrb[5].mxu1 }
 0x104   : > { %v989_v54 = vadd.f32 %v988_v52, %v987_v50  ;;  %v990_v55 = vpop.f32.mrb[6].mxu0  ;;  %v1266_v56 = vadd.f32 %v1012_v53, %v1011_v51  ;;  %v1014_v57 = vpop.f32.mrb[6].mxu1  ;;  %v685_v50 = vmul.f32 %v1255_v43, %v1255_v43 }
 0x105   : > { %v991_v58 = vpop.f32.mrb[7].mxu0  ;;  %v1015_v59 = vpop.f32.mrb[7].mxu1 }
 0x106   : > { %v659_v60 = vadd.f32 %v989_v54, %v658_v46  ;;  %v678_v61 = vmul.f32 %v989_v54, %v989_v54  ;;  %v992_v62 = vadd.f32 %v991_v58, %v990_v55  ;;  %v1268_v63 = vadd.f32 %v1015_v59, %v1014_v57 }
 0x107   : > { %v686_v53 = vmul.f32 %v1266_v56, %v1266_v56 }
 0x108   : > { %v693_v0 = vadd.f32 %v692_v49, %v678_v61  ;;  %v926_v1 = vpack.c.bf16 %v992_v62, %v989_v54  ;;  %v660_v2 = vadd.f32 %v992_v62, %v659_v60  ;;  %v679_v3 = vmul.f32 %v992_v62, %v992_v62 }
 0x109   : > { %v946_v4 = vpack.c.bf16 %v1268_v63, %v1266_v56  ;;  %v687_v57 = vmul.f32 %v1268_v63, %v1268_v63 }
 0x10a   : > { %958 = vst [vmem:[%s1260_s12 + $0x8] sm:$0xff] %v926_v1   ;;  %v694_v5 = vadd.f32 %v693_v0, %v679_v3  ;;  %v993_v6 = vpop.f32.mrb[8].mxu0  ;;  %v1017_v7 = vpop.f32.mrb[8].mxu1 }
 0x10b   : > { %v994_v8 = vpop.f32.mrb[9].mxu0  ;;  %962 = vst [vmem:[%s1260_s12 + $0x28] sm:$0xff] %v946_v4   ;;  %v1018_v9 = vpop.f32.mrb[9].mxu1 }
 0x10c   : > { %v995_v10 = vadd.f32 %v994_v8, %v993_v6  ;;  %v996_v11 = vpop.f32.mrb[10].mxu0  ;;  %v1019_v12 = vadd.f32 %v1018_v9, %v1017_v7  ;;  %v1020_v13 = vpop.f32.mrb[10].mxu1 }
 0x10d   : > { %v997_v14 = vpop.f32.mrb[11].mxu0  ;;  %v1021_v15 = vpop.f32.mrb[11].mxu1 }
 0x10e   : > { %v661_v16 = vadd.f32 %v995_v10, %v660_v2  ;;  %v680_v17 = vmul.f32 %v995_v10, %v995_v10  ;;  %v998_v18 = vadd.f32 %v997_v14, %v996_v11  ;;  %v1022_v19 = vadd.f32 %v1021_v15, %v1020_v13 }
 0x10f   : > { %v688_v60 = vmul.f32 %v1019_v12, %v1019_v12 }
 0x110   : > { %v695_v20 = vadd.f32 %v694_v5, %v680_v17  ;;  %v931_v21 = vpack.c.bf16 %v998_v18, %v995_v10  ;;  %v662_v22 = vadd.f32 %v998_v18, %v661_v16  ;;  %v681_v23 = vmul.f32 %v998_v18, %v998_v18 }
 0x111   : > { %v951_v24 = vpack.c.bf16 %v1022_v19, %v1019_v12  ;;  %v689_v0 = vmul.f32 %v1022_v19, %v1022_v19 }
 0x112   : > { %959 = vst [vmem:[%s1260_s12 + $0x10] sm:$0xff] %v931_v21   ;;  %v696_v25 = vadd.f32 %v695_v20, %v681_v23  ;;  %v999_v26 = vpop.f32.mrb[12].mxu0  ;;  %v1023_v27 = vpop.f32.mrb[12].mxu1 }
 0x113   : > { %v1000_v28 = vpop.f32.mrb[13].mxu0  ;;  %963 = vst [vmem:[%s1260_s12 + $0x30] sm:$0xff] %v951_v24   ;;  %v1024_v29 = vpop.f32.mrb[13].mxu1 }
 0x114   : > { %v1001_v30 = vadd.f32 %v1000_v28, %v999_v26  ;;  %v1002_v31 = vpop.f32.mrb[14].mxu0  ;;  %v1025_v32 = vadd.f32 %v1024_v29, %v1023_v27  ;;  %v1026_v33 = vpop.f32.mrb[14].mxu1 }
 0x115   : > { %v1003_v34 = vpop.f32.mrb[15].mxu0  ;;  %v1027_v35 = vpop.f32.mrb[15].mxu1 }
 0x116   : > { %v663_v36 = vadd.f32 %v1001_v30, %v662_v22  ;;  %v682_v37 = vmul.f32 %v1001_v30, %v1001_v30  ;;  %v1004_v39 = vadd.f32 %v1003_v34, %v1002_v31  ;;  %v1028_v40 = vadd.f32 %v1027_v35, %v1026_v33 }
 0x117   : > { %v690_v1 = vmul.f32 %v1025_v32, %v1025_v32 }
 0x118   : > { %v697_v41 = vadd.f32 %v696_v25, %v682_v37  ;;  %v936_v42 = vpack.c.bf16 %v1004_v39, %v1001_v30  ;;  %v664_v44 = vadd.f32 %v1004_v39, %v663_v36  ;;  %v683_v45 = vmul.f32 %v1004_v39, %v1004_v39 }
 0x119   : > { %v956_v46 = vpack.c.bf16 %v1028_v40, %v1025_v32  ;;  %v691_v5 = vmul.f32 %v1028_v40, %v1028_v40 }
 0x11a   : > { %960 = vst [vmem:[%s1260_s12 + $0x18] sm:$0xff] %v936_v42   ;;  %v665_v48 = vadd.f32 %v1253_v38, %v664_v44  ;;  %v698_v49 = vadd.f32 %v697_v41, %v683_v45 }
 0x11b   : > { %964 = vst [vmem:[%s1260_s12 + $0x38] sm:$0xff] %v956_v46  }
 0x11c   : > { %v666_v51 = vadd.f32 %v1255_v43, %v665_v48  ;;  %v699_v52 = vadd.f32 %v698_v49, %v684_v47 }
 0x11e   : > { %v700_v54 = vadd.f32 %v699_v52, %v685_v50  ;;  %v667_v55 = vadd.f32 %v1266_v56, %v666_v51 }
 0x120   : > { %v668_v38 = vadd.f32 %v1268_v63, %v667_v55  ;;  %v701_v58 = vadd.f32 %v700_v54, %v686_v53 }
 0x122   : > { %v669_v59 = vadd.f32 %v1019_v12, %v668_v38  ;;  %v702_v61 = vadd.f32 %v701_v58, %v687_v57 }
 0x124   : > { %v703_v62 = vadd.f32 %v702_v61, %v688_v60  ;;  %v670_v43 = vadd.f32 %v1022_v19, %v669_v59 }
 0x126   : > { %v704_v2 = vadd.f32 %v703_v62, %v689_v0  ;;  %v671_v3 = vadd.f32 %v1025_v32, %v670_v43 }
 0x128   : > { %v705_v4 = vadd.f32 %v704_v2, %v690_v1  ;;  %v672_v56 = vadd.f32 %v1028_v40, %v671_v3 }
 0x12a   : > { %v706_v63 = vadd.f32 %v705_v4, %v691_v5  ;;  %674 = vst [vmem:[%s244_s19] sm:$0xff] %v672_v56 }
 0x12c   : > { %708 = vst [vmem:[%s248_s23] sm:$0xff] %v706_v63 }
 0x12d PF: > { %s15_s17 = sadd.s32 1, %s1132_s17   ;;  %s1312_s15 = smov %s1128_s16 }
 0x12e   : > { %p12_p6 = scmp.ge.s32.totalorder %s15_s17, 4   ;;  %s1313_s16 = smov %s1315_s18 }
 0x130   :  { %14 = sbr.rel (!%p12_p6) target bundleno = 2 (0x2), region = 86 }

</bundles_post_ra>
